<compile_context>
chip_gen: v7x
topology: tpu7x:2x2x1
jax: 0.10.0
libtpu: 0.0.40
codegen_flags: <defaults>
</compile_context>

<pallas_src>
import functools
import math

import numpy as np

import jax
import jax.numpy as jnp
from jax import lax
from jax.experimental import pallas as pl
from jax.experimental.pallas import tpu as pltpu

LANE = 128
N_PAD = 128  # lane-dense logits width (sliced back to num_labels in the wrapper)


def _round_up(x, m):
    return -(-x // m) * m


# ----------------------------- fused Pallas kernel -----------------------------

def _textcnn_fused_kernel(em_ref, wconv_ref, bconv_ref, pmask_ref, wcls_ref,
                          bcls_ref, o_ref, *, TB, S, ks_max):
    """One grid step = TB batch rows.

    em_ref    : (TB*S, E2P)       bf16  flattened embedding slab (both channels)
    wconv_ref : (ks_max, E2P, FP) bf16  conv taps, all branches/pool-slots packed
    bconv_ref : (1, FP)           f32   conv bias per packed column
    pmask_ref : (TB*S, FP)        f32   0/1 adaptive-pool segment mask
    wcls_ref  : (FP, N_PAD)       bf16  fused classifier weight
    bcls_ref  : (1, N_PAD)        f32   classifier bias
    o_ref     : (TB, N_PAD)       f32   logits (lane padded)
    """
    R = TB * S
    em = em_ref[...]                                        # (R, E2P) bf16

    # Conv = sum over taps dt of full-slab matmuls; the dt alignment is applied
    # to the matmul *result* with a sublane roll (XLU) so the input slab is
    # never sliced at unaligned sublane offsets.  Rows that pick up wrapped /
    # cross-batch contributions all have t >= L and are zeroed by the pool mask.
    acc = jnp.dot(em, wconv_ref[0], preferred_element_type=jnp.float32)
    for dt in range(1, ks_max):
        p = jnp.dot(em, wconv_ref[dt], preferred_element_type=jnp.float32)
        acc = acc + pltpu.roll(p, R - dt, axis=0)           # row r <- row r + dt
    y = jnp.maximum(acc + bconv_ref[...], 0.0)              # bias + ReLU, (R, FP)

    # Adaptive k-max pooling for all branches / pool slots at once: each packed
    # column owns exactly one (branch, slot) segment; the zero fill is exact
    # because y is post-ReLU.  A log2(S)-step max/roll tree reduces every S-row
    # batch group (wrapped rows never reach the rows we read).
    ym = y * pmask_ref[...]
    cov = 1
    while cov < S:
        sh = min(cov, S - cov)
        ym = jnp.maximum(ym, pltpu.roll(ym, R - sh, axis=0))
        cov += sh
    # Row b*S of ym now holds batch-row b's pooled features; gather those TB
    # rows with a tiny 0/1 selection matmul (keeps everything 2-D / MXU-only).
    r_idx = lax.broadcasted_iota(jnp.int32, (TB, R), 1)
    b_idx = lax.broadcasted_iota(jnp.int32, (TB, R), 0)
    sel = (r_idx == b_idx * S).astype(jnp.float32)
    pooled = jnp.dot(sel, ym, preferred_element_type=jnp.float32)   # (TB, FP)

    # Single fused classifier matmul (all branches / pool slots at once).
    logits = jnp.dot(pooled.astype(wcls_ref.dtype), wcls_ref[...],
                     preferred_element_type=jnp.float32) + bcls_ref[...]
    o_ref[...] = logits.astype(o_ref.dtype)                 # (TB, N_PAD)


# ------------------------------- param packing ---------------------------------

def prepare_params(raw, convs_cfg, embedding_dim, num_labels,
                   n_pad=N_PAD, dtype=jnp.bfloat16):
    """One-time weight fusion / reshapes (hoisted out of the forward pass)."""
    E = embedding_dim
    E2 = 2 * E
    E2P = _round_up(max(E2, LANE), LANE)

    # Fused embedding table: [static E | non-static E | zero pad] along lanes.
    table = jnp.concatenate([raw["emb_static"], raw["emb_nonstatic"]], axis=1)
    table = jnp.pad(table, ((0, 0), (0, E2P - E2))).astype(dtype)

    Cs = [c["out_channels"] for c in convs_cfg]
    # torch's cat(r, dim=2).view(B, -1) requires equal out_channels across
    # branches; the packed classifier column order below assumes it too.
    assert len(set(Cs)) == 1, "all branches must share out_channels"
    C = Cs[0]
    k_list = [c["k_max_pooling"] for c in convs_cfg]
    ks_list = [c["kernel_size"] for c in convs_cfg]
    k_total = sum(k_list)
    ks_max = max(ks_list)
    F = C * k_total
    FP = _round_up(max(F, LANE), LANE)

    wconv_blocks, bias_cols, wcls_rows = [], [], []
    koff = 0
    for cfg, (w, b) in zip(convs_cfg, raw["convs"]):
        ks, k = cfg["kernel_size"], cfg["k_max_pooling"]
        # torch weight (C, 2, ks, E) -> per-tap (ks, 2E, C), channel-major then
        # e (matches the fused table's lane layout); zero-pad to ks_max taps and
        # E2P lanes; replicate once per pool slot so each packed column owns a
        # single (branch, slot) segment.
        wj = jnp.transpose(w, (2, 1, 3, 0)).reshape(ks, E2, C)
        wj = jnp.pad(wj, ((0, ks_max - ks), (0, E2P - E2), (0, 0)))
        wconv_blocks.append(jnp.concatenate([wj] * k, axis=2))  # (ks_max, E2P, k*C)
        bias_cols.append(jnp.tile(b, (k,)))                     # (k*C,)
        # Packed column f = koff*C + i*C + c maps to torch's flattened feature
        # d = c*k_total + koff + i  (the .view(B, -1) order).
        d = (jnp.arange(k)[:, None] + koff) + jnp.arange(C)[None, :] * k_total
        wcls_rows.append(raw["cls_w"][:, d.reshape(-1)].T)      # (k*C, num_labels)
        koff += k

    wconv = jnp.concatenate(wconv_blocks, axis=2)
    wconv = jnp.pad(wconv, ((0, 0), (0, 0), (0, FP - F))).astype(dtype)
    bconv = jnp.pad(jnp.concatenate(bias_cols), (0, FP - F))
    bconv = bconv.reshape(1, FP).astype(jnp.float32)
    wcls = jnp.concatenate(wcls_rows, axis=0)
    wcls = jnp.pad(wcls, ((0, FP - F), (0, n_pad - num_labels))).astype(dtype)
    bcls = jnp.pad(raw["cls_b"], (0, n_pad - num_labels)).reshape(1, n_pad)
    bcls = bcls.astype(jnp.float32)

    return {"table": table, "wconv": wconv, "bconv": bconv,
            "wcls": wcls, "bcls": bcls, "num_labels": num_labels}


def _pool_mask(convs_cfg, S, TB, FP):
    """0/1 mask (TB*S, FP): column f is 1 on its adaptive-pool segment rows."""
    C = convs_cfg[0]["out_channels"]
    mask = np.zeros((S, FP), np.float32)
    f = 0
    for cfg in convs_cfg:
        ks, k = cfg["kernel_size"], cfg["k_max_pooling"]
        L = S - ks + 1
        # TODO(synk): torch AdaptiveMaxPool repeats elements when k > L; an
        #             empty segment here would read 0 instead (not hit in test).
        for i in range(k):
            lo = (i * L) // k
            hi = -(-((i + 1) * L) // k)
            mask[lo:hi, f:f + C] = 1.0
            f += C
    return jnp.asarray(np.tile(mask, (TB, 1)))                # (TB*S, FP)


# ---------------------------------- forward -------------------------------------

def textcnn_forward(token_ids, params, convs_cfg, *, tb=8):
    B, S = token_ids.shape
    table = params["table"]
    E2P = table.shape[1]
    FP = params["wconv"].shape[2]
    n_pad = params["wcls"].shape[1]
    ks_max = max(c["kernel_size"] for c in convs_cfg)

    TB = min(tb, B)
    assert B % TB == 0, "batch must be a multiple of the batch tile"

    # Single fused embedding gather -> lane-dense (B*S, E2P) bf16 slab.
    em = table[token_ids].reshape(B * S, E2P)
    pmask = _pool_mask(convs_cfg, S, TB, FP)

    kern = functools.partial(_textcnn_fused_kernel, TB=TB, S=S, ks_max=ks_max)
    out = pl.pallas_call(
        kern,
        out_shape=jax.ShapeDtypeStruct((B, n_pad), jnp.float32),
        grid=(B // TB,),
        in_specs=[
            pl.BlockSpec((TB * S, E2P), lambda b: (b, 0)),
            # Grid-invariant operands (constant index_map -> fetched once).
            # TODO(synk): add pipeline_mode=pl.Buffered(1) to these if VMEM ever
            #             gets tight on v7x (64 MiB); unnecessary at these sizes.
            pl.BlockSpec((ks_max, E2P, FP), lambda b: (0, 0, 0)),
            pl.BlockSpec((1, FP), lambda b: (0, 0)),
            pl.BlockSpec((TB * S, FP), lambda b: (0, 0)),
            pl.BlockSpec((FP, n_pad), lambda b: (0, 0)),
            pl.BlockSpec((1, n_pad), lambda b: (0, 0)),
        ],
        out_specs=pl.BlockSpec((TB, n_pad), lambda b: (b, 0)),
        compiler_params=pltpu.CompilerParams(
            # Parallel batch axis -> shards across v7x's 2 TensorCores.
            dimension_semantics=("parallel",),
            # Tiny here; for realistic S re-derive TB against 64 MiB on v7x.
            vmem_limit_bytes=32 * 1024 * 1024,
        ),
    )(em, params["wconv"], params["bconv"], pmask, params["wcls"], params["bcls"])
    return out[:, :params["num_labels"]]                      # (B, num_labels)


# --------------------------- pure-JAX reference ----------------------------

def textcnn_reference(token_ids, raw, convs_cfg):
    em1 = raw["emb_static"][token_ids]
    em2 = raw["emb_nonstatic"][token_ids]
    em = jnp.stack([em1, em2], axis=1)                        # (B, 2, S, E) NCHW
    B = em.shape[0]
    feats = []
    for cfg, (w, b) in zip(convs_cfg, raw["convs"]):
        k = cfg["k_max_pooling"]
        y = jax.lax.conv_general_dilated(
            em, w, window_strides=(1, 1), padding="VALID",
            dimension_numbers=("NCHW", "OIHW", "NCHW"),
        ) + b.reshape(1, -1, 1, 1)                            # (B, C, L, 1)
        y = jnp.maximum(y, 0.0)
        L = y.shape[2]
        segs = []
        for i in range(k):
            s = (i * L) // k
            e = -(-((i + 1) * L) // k)
            segs.append(jnp.max(y[:, :, s:e, :], axis=2, keepdims=True))
        feats.append(jnp.concatenate(segs, axis=2))           # (B, C, k, 1)
    x = jnp.concatenate(feats, axis=2).reshape(B, -1)
    return x @ raw["cls_w"].T + raw["cls_b"]


# --------------------------------- main ------------------------------------

if __name__ == "__main__":
    vocab_size = 32
    embedding_dim = 16
    seq_len = 8
    batch = 16          # grid = batch // TB = 2 (>= 2 -> both v7x cores get work)
    num_labels = 3
    convs_cfg = [
        {"out_channels": 4, "kernel_size": 2, "k_max_pooling": 2},
        {"out_channels": 4, "kernel_size": 3, "k_max_pooling": 2},
    ]
    final_dim = sum(c["out_channels"] * c["k_max_pooling"] for c in convs_cfg)

    key = jax.random.PRNGKey(0)
    k_es, k_en, k_cls, k_x, *k_convs = jax.random.split(key, 4 + 2 * len(convs_cfg))

    raw_params = {
        # init_weights: Embedding -> normal(0, 0.1) (embedding_matrix is None)
        "emb_static": 0.1 * jax.random.normal(k_es, (vocab_size, embedding_dim), jnp.float32),
        "emb_nonstatic": 0.1 * jax.random.normal(k_en, (vocab_size, embedding_dim), jnp.float32),
        "convs": [],
        # init_weights: Linear -> weight normal(0, 0.1), bias zero
        "cls_w": 0.1 * jax.random.normal(k_cls, (num_labels, final_dim), jnp.float32),
        "cls_b": jnp.zeros((num_labels,), jnp.float32),
    }
    for i, cfg in enumerate(convs_cfg):
        C, ks = cfg["out_channels"], cfg["kernel_size"]
        n = ks * embedding_dim * C
        w = math.sqrt(2.0 / n) * jax.random.normal(
            k_convs[2 * i], (C, 2, ks, embedding_dim), jnp.float32)
        bound = 1.0 / math.sqrt(2 * ks * embedding_dim)       # torch Conv2d bias init
        b = jax.random.uniform(k_convs[2 * i + 1], (C,), jnp.float32, -bound, bound)
        raw_params["convs"].append((w, b))

    token_ids = jax.random.randint(k_x, (batch, seq_len), 0, vocab_size, jnp.int32)

    params = prepare_params(raw_params, convs_cfg, embedding_dim, num_labels)

    logits = textcnn_forward(token_ids, params, convs_cfg, tb=8)
    logits = jax.block_until_ready(logits)

    ref = jax.block_until_ready(textcnn_reference(token_ids, raw_params, convs_cfg))
    assert logits.shape == (batch, num_labels), logits.shape
    # bf16 matmul inputs (f32 accumulation) -> relaxed tolerance vs f32 reference.
    assert jnp.allclose(logits, ref, atol=2e-2, rtol=2e-2), (logits, ref)

    print("KERNEL_OK")
</pallas_src>

<mosaic_0001>
module attributes {stable_mosaic.version = 11 : i64} {
  func.func @_textcnn_fused_kernel(%arg0: i32, %arg1: memref<64x128xbf16, #tpu.memory_space<vmem>>, %arg2: memref<3x128x128xbf16, #tpu.memory_space<vmem>>, %arg3: memref<1x128xf32, #tpu.memory_space<vmem>>, %arg4: memref<64x128xf32, #tpu.memory_space<vmem>>, %arg5: memref<128x128xbf16, #tpu.memory_space<vmem>>, %arg6: memref<1x128xf32, #tpu.memory_space<vmem>>, %arg7: memref<8x128xf32, #tpu.memory_space<vmem>>) attributes {dimension_semantics = [#tpu.dimension_semantics<parallel>], iteration_bounds = array<i64: 2>, scalar_prefetch = 0 : i64, scratch_operands = 0 : i64, tpu.core_type = #tpu.core_type<tc>, window_params = [{transform_indices = @transform_0, window_bounds = array<i64: 64, 128>}, {pipeline_mode = #tpu.pipeline_mode<synchronous>, transform_indices = @transform_1, window_bounds = array<i64: 3, 128, 128>}, {pipeline_mode = #tpu.pipeline_mode<synchronous>, transform_indices = @transform_2, window_bounds = array<i64: 1, 128>}, {pipeline_mode = #tpu.pipeline_mode<synchronous>, transform_indices = @transform_3, window_bounds = array<i64: 64, 128>}, {pipeline_mode = #tpu.pipeline_mode<synchronous>, transform_indices = @transform_4, window_bounds = array<i64: 128, 128>}, {pipeline_mode = #tpu.pipeline_mode<synchronous>, transform_indices = @transform_5, window_bounds = array<i64: 1, 128>}, {transform_indices = @transform_6, window_bounds = array<i64: 8, 128>}]} {
    %c0 = arith.constant 0 : index
    %c0_0 = arith.constant 0 : index
    %0 = vector.load %arg1[%c0, %c0_0] : memref<64x128xbf16, #tpu.memory_space<vmem>>, vector<64x128xbf16>
    %c0_1 = arith.constant 0 : index
    %c0_2 = arith.constant 0 : index
    %c0_3 = arith.constant 0 : index
    %1 = vector.load %arg2[%c0_1, %c0_2, %c0_3] : memref<3x128x128xbf16, #tpu.memory_space<vmem>>, vector<1x128x128xbf16>
    %2 = vector.shape_cast %1 : vector<1x128x128xbf16> to vector<128x128xbf16>
    %cst = arith.constant dense<0.000000e+00> : vector<64x128xf32>
    %3 = tpu.matmul %0, %2, %cst {dimension_numbers = #tpu.dot_dimension_numbers<[1], [0], [0], [1], [0, 0, 1, 1], [], []>} : vector<64x128xbf16>, vector<128x128xbf16>, vector<64x128xf32> -> vector<64x128xf32>
    %c1 = arith.constant 1 : index
    %c0_4 = arith.constant 0 : index
    %c0_5 = arith.constant 0 : index
    %4 = vector.load %arg2[%c1, %c0_4, %c0_5] : memref<3x128x128xbf16, #tpu.memory_space<vmem>>, vector<1x128x128xbf16>
    %5 = vector.shape_cast %4 : vector<1x128x128xbf16> to vector<128x128xbf16>
    %cst_6 = arith.constant dense<0.000000e+00> : vector<64x128xf32>
    %6 = tpu.matmul %0, %5, %cst_6 {dimension_numbers = #tpu.dot_dimension_numbers<[1], [0], [0], [1], [0, 0, 1, 1], [], []>} : vector<64x128xbf16>, vector<128x128xbf16>, vector<64x128xf32> -> vector<64x128xf32>
    %c63_i32 = arith.constant 63 : i32
    %7 = tpu.dynamic_rotate %6 by %c63_i32 dim 0 : vector<64x128xf32>, i32 -> vector<64x128xf32>
    %8 = arith.addf %3, %7 : vector<64x128xf32>
    %c2 = arith.constant 2 : index
    %c0_7 = arith.constant 0 : index
    %c0_8 = arith.constant 0 : index
    %9 = vector.load %arg2[%c2, %c0_7, %c0_8] : memref<3x128x128xbf16, #tpu.memory_space<vmem>>, vector<1x128x128xbf16>
    %10 = vector.shape_cast %9 : vector<1x128x128xbf16> to vector<128x128xbf16>
    %cst_9 = arith.constant dense<0.000000e+00> : vector<64x128xf32>
    %11 = tpu.matmul %0, %10, %cst_9 {dimension_numbers = #tpu.dot_dimension_numbers<[1], [0], [0], [1], [0, 0, 1, 1], [], []>} : vector<64x128xbf16>, vector<128x128xbf16>, vector<64x128xf32> -> vector<64x128xf32>
    %c62_i32 = arith.constant 62 : i32
    %12 = tpu.dynamic_rotate %11 by %c62_i32 dim 0 : vector<64x128xf32>, i32 -> vector<64x128xf32>
    %13 = arith.addf %8, %12 : vector<64x128xf32>
    %c0_10 = arith.constant 0 : index
    %c0_11 = arith.constant 0 : index
    %14 = vector.load %arg3[%c0_10, %c0_11] : memref<1x128xf32, #tpu.memory_space<vmem>>, vector<1x128xf32>
    %15 = vector.broadcast %14 : vector<1x128xf32> to vector<64x128xf32>
    %16 = arith.addf %13, %15 : vector<64x128xf32>
    %cst_12 = arith.constant 0.000000e+00 : f32
    %17 = vector.broadcast %cst_12 : f32 to vector<64x128xf32>
    %18 = arith.maximumf %16, %17 : vector<64x128xf32>
    %c0_13 = arith.constant 0 : index
    %c0_14 = arith.constant 0 : index
    %19 = vector.load %arg4[%c0_13, %c0_14] : memref<64x128xf32, #tpu.memory_space<vmem>>, vector<64x128xf32>
    %20 = arith.mulf %18, %19 : vector<64x128xf32>
    %c63_i32_15 = arith.constant 63 : i32
    %21 = tpu.dynamic_rotate %20 by %c63_i32_15 dim 0 : vector<64x128xf32>, i32 -> vector<64x128xf32>
    %22 = arith.maximumf %20, %21 : vector<64x128xf32>
    %c62_i32_16 = arith.constant 62 : i32
    %23 = tpu.dynamic_rotate %22 by %c62_i32_16 dim 0 : vector<64x128xf32>, i32 -> vector<64x128xf32>
    %24 = arith.maximumf %22, %23 : vector<64x128xf32>
    %c60_i32 = arith.constant 60 : i32
    %25 = tpu.dynamic_rotate %24 by %c60_i32 dim 0 : vector<64x128xf32>, i32 -> vector<64x128xf32>
    %26 = arith.maximumf %24, %25 : vector<64x128xf32>
    %27 = tpu.iota {dimensions = array<i32: 1>} : vector<8x64xi32>
    %28 = tpu.iota {dimensions = array<i32: 0>} : vector<8x64xi32>
    %c8_i32 = arith.constant 8 : i32
    %29 = vector.broadcast %c8_i32 : i32 to vector<8x64xi32>
    %30 = arith.muli %28, %29 : vector<8x64xi32>
    %31 = arith.cmpi eq, %27, %30 : vector<8x64xi32>
    %32 = arith.extui %31 : vector<8x64xi1> to vector<8x64xi32>
    %33 = arith.sitofp %32 : vector<8x64xi32> to vector<8x64xf32>
    %cst_17 = arith.constant dense<0.000000e+00> : vector<8x128xf32>
    %34 = tpu.matmul %33, %26, %cst_17 {dimension_numbers = #tpu.dot_dimension_numbers<[1], [0], [0], [1], [0, 0, 1, 1], [], []>} : vector<8x64xf32>, vector<64x128xf32>, vector<8x128xf32> -> vector<8x128xf32>
    %35 = arith.truncf %34 : vector<8x128xf32> to vector<8x128xbf16>
    %c0_18 = arith.constant 0 : index
    %c0_19 = arith.constant 0 : index
    %36 = vector.load %arg5[%c0_18, %c0_19] : memref<128x128xbf16, #tpu.memory_space<vmem>>, vector<128x128xbf16>
    %cst_20 = arith.constant dense<0.000000e+00> : vector<8x128xf32>
    %37 = tpu.matmul %35, %36, %cst_20 {dimension_numbers = #tpu.dot_dimension_numbers<[1], [0], [0], [1], [0, 0, 1, 1], [], []>} : vector<8x128xbf16>, vector<128x128xbf16>, vector<8x128xf32> -> vector<8x128xf32>
    %c0_21 = arith.constant 0 : index
    %c0_22 = arith.constant 0 : index
    %38 = vector.load %arg6[%c0_21, %c0_22] : memref<1x128xf32, #tpu.memory_space<vmem>>, vector<1x128xf32>
    %39 = vector.broadcast %38 : vector<1x128xf32> to vector<8x128xf32>
    %40 = arith.addf %37, %39 : vector<8x128xf32>
    %c0_23 = arith.constant 0 : index
    %c0_24 = arith.constant 0 : index
    %41 = vector.load %arg7[%c0_23, %c0_24] : memref<8x128xf32, #tpu.memory_space<vmem>>, vector<8x128xf32>
    tpu.vector_store %arg7[%c0_23, %c0_24], %40 {strides = array<i32>} : memref<8x128xf32, #tpu.memory_space<vmem>>, vector<8x128xf32>,
    return
  }
  func.func @transform_0(%arg0: i32) -> (i32, i32) {
    %c0_i32 = arith.constant 0 : i32
    %c0_i32_0 = arith.constant 0 : i32
    return %arg0, %c0_i32 : i32, i32
  }
  func.func @transform_1(%arg0: i32) -> (i32, i32, i32) {
    %c0_i32 = arith.constant 0 : i32
    %c0_i32_0 = arith.constant 0 : i32
    %c0_i32_1 = arith.constant 0 : i32
    %c0_i32_2 = arith.constant 0 : i32
    return %c0_i32, %c0_i32_0, %c0_i32_1 : i32, i32, i32
  }
  func.func @transform_2(%arg0: i32) -> (i32, i32) {
    %c0_i32 = arith.constant 0 : i32
    %c0_i32_0 = arith.constant 0 : i32
    %c0_i32_1 = arith.constant 0 : i32
    return %c0_i32, %c0_i32_0 : i32, i32
  }
  func.func @transform_3(%arg0: i32) -> (i32, i32) {
    %c0_i32 = arith.constant 0 : i32
    %c0_i32_0 = arith.constant 0 : i32
    %c0_i32_1 = arith.constant 0 : i32
    return %c0_i32, %c0_i32_0 : i32, i32
  }
  func.func @transform_4(%arg0: i32) -> (i32, i32) {
    %c0_i32 = arith.constant 0 : i32
    %c0_i32_0 = arith.constant 0 : i32
    %c0_i32_1 = arith.constant 0 : i32
    return %c0_i32, %c0_i32_0 : i32, i32
  }
  func.func @transform_5(%arg0: i32) -> (i32, i32) {
    %c0_i32 = arith.constant 0 : i32
    %c0_i32_0 = arith.constant 0 : i32
    %c0_i32_1 = arith.constant 0 : i32
    return %c0_i32, %c0_i32_0 : i32, i32
  }
  func.func @transform_6(%arg0: i32) -> (i32, i32) {
    %c0_i32 = arith.constant 0 : i32
    %c0_i32_0 = arith.constant 0 : i32
    return %arg0, %c0_i32 : i32, i32
  }
}

</mosaic_0001>

<bundles_post_ra>
// kernel: tpu_custom_call.1
= control target key start
LH: loop header
LB: loop body
LE: loop exit
PB: predicated region body
PF: predicated region fallthrough
CT: control target
= control target key end

     0   :  { %s2172_s0 = inlined_call_operand.hbm [shape: bf16[128,128], index: 0, kind: input, shape index: {}]   ;;  %s2173_s1 = inlined_call_operand.hbm [shape: bf16[3,128,128], index: 1, kind: input, shape index: {}]   ;;  %s2174_s2 = inlined_call_operand.vmem [shape: f32[1,128], index: 2, kind: input, shape index: {}]   ;;  %s2175_s3 = inlined_call_operand.hbm [shape: f32[64,128], index: 3, kind: input, shape index: {}]   ;;  %s2176_s4 = inlined_call_operand.hbm [shape: bf16[128,128], index: 4, kind: input, shape index: {}]   ;;  %s2177_s5 = inlined_call_operand.vmem [shape: f32[1,128], index: 5, kind: input, shape index: {}]   ;;  %s2178_s6 = inlined_call_operand.hbm [shape: f32[16,128], index: 6, kind: output, shape index: {}]  }
   0x1   :  { %2186 = sst [smem:[#allocation15_spill]] %s2173_s1 }
   0x2   :  { %11 = vsyncpa [#allocation3], 0 }
   0x3   :  { %13 = vsyncpa [#allocation3 + $0x1], 0 }
   0x4   :  { %14 = vsyncpa [#allocation6], 0 }
   0x5   :  { %15 = vsyncpa [#allocation9], 0 }
   0x6   :  { %16 = vsyncpa [#allocation4], 0 }
   0x7   :  { %18 = vsyncpa [#allocation4 + $0x1], 0  ;;  %s1793_s21 = smov 0   ;;  %s1795_s22 = smov 0  }
   0x8   :  { %s1797_s23 = smov 0   ;;  %s1799_s24 = smov 0  }
   0x9 LB: > { %s1814_s25 = sadd.s32 4294967295, %s1744_s24   ;;  %s1199_s26 = sadd.s32 4294967294, %s1744_s24   ;;  %s1744_s24 = sphi %s1799_s24, %s2209_s24   ;;  %s1740_s23 = sphi %s1797_s23, %s2208_s23   ;;  %s1736_s22 = sphi %s1795_s22, %s2207_s22   ;;  %s1732_s21 = sphi %s1793_s21, %s2206_s21  }
   0xa   : > { %p44_p0 = scmp.ne.s32.totalorder %s1736_s22, %s1732_s21  ;;  %p2179_p1 = scmp.eq.s32.totalorder %s1814_s25, 0 }
   0xb   : > { %p179_p3 = scmp.eq.s32.totalorder %s1199_s26, 1  ;;  %p1200_p5 = scmp.ge.s32.totalorder %s1744_s24, 1 }
   0xc   : > { %p1823_p4 = por %p2179_p1, %p44_p0  ;;  %p186_p7 = scmp.lt.s32.totalorder %s1744_s24, 3 }
   0xd   : > { %p1828_p6 = por %p179_p3, %p44_p0  ;;  %s1746_s30 = smov [#allocation5]  }
   0xe   : > { %s2187_s27 = scalar_select %p1823_p4, 1, 0 }
   0xf   : > { %s2188_s28 = scalar_select %p1828_p6, 1, 0 }
  0x10   : > { %p1833_p8 = pnand %p1200_p5, %p186_p7  ;;  %s198_s7 = sshll.u32 %s1746_s30, 4  ;;  %s1837_s7 = int_to_ptr.vmem [resolvable:$true] %s198_s7 }
  0x11   : > { %s1747_s9 = smov [#allocation7]   ;;  %s2191_s1 = sld [smem:[#allocation15_spill]] }
  0x12   : > { %s2189_s29 = scalar_select %p1833_p8, 1, 0 }
  0x13   : > { %p1452_p9 = pneg %p1833_p8  ;;  %s214_s10 = sshll.u32 %s1747_s9, 4  ;;  %s1848_s10 = int_to_ptr.vmem [resolvable:$true] %s214_s10 }
  0x15   : > { %p1844_p11 = pnand %p1452_p9, %p2179_p1 }
  0x17   : > { %s1556_s13 = scalar_lea.hbm %s2191_s1, 3072  ;;  %p1858_p13 = pneg %p1844_p11 }
  0x18   : > { %p1557_p12 = scmp.ne.s32.totalorder %s2191_s1, %s1556_s13  ;;  %p1563_p5 = scmp.lt.u32.totalorder %s1556_s13, %s2191_s1 }
  0x1a   : > { %p1559_p0 = pnand %p1858_p13, %p1557_p12 }
  0x1c   : > { %p1560_p3 = pneg %p1559_p0 }
  0x1e   : > { %p1565_p7 = pnand %p1563_p5, %p1560_p3 }
  0x20   : > { %1568 = shalt.err (!%p1565_p7)
}
  0x21   : > { %s1569_s19 = scalar_lea.vmem %s1837_s7, 3072  ;;  %p1577_p2 = scmp.lt.s32.totalorder %s1837_s7, %s1837_s7 }
  0x22   : > { %p1570_p9 = scmp.ne.s32.totalorder %s1837_s7, %s1569_s19  ;;  %p1578_p6 = scmp.lt.s32.totalorder %s1569_s19, %s1569_s19 }
  0x24   : > { %p1572_p10 = pnand %p1570_p9, %p1858_p13  ;;  %p1579_p12 = por %p1578_p6, %p1577_p2 }
  0x26   : > { %p1573_p1 = pneg %p1572_p10 }
  0x28   : > { %p1580_p0 = pnand %p1579_p12, %p1573_p1 }
  0x2a   : > { %1583 = shalt.err (!%p1580_p0)
}
  0x2b   : > { %s2180_s20 = smov 64   ;;  %s2182_s26 = smov 4  }
  0x2c   : > { %1455 = dma.hbm_to_vmem [thread:$0]  (!%p1844_p11), %s2191_s1, 3072, %s1837_s7, [#allocation6], %s2180_s20, %s2180_s20, %s2182_s26  }
  0x2d   : > { %s1584_s13 = scalar_lea.hbm %s2175_s3, 1024 }
  0x2e   : > { %p1585_p1 = scmp.ne.s32.totalorder %s2175_s3, %s1584_s13  ;;  %p1591_p10 = scmp.lt.u32.totalorder %s1584_s13, %s2175_s3 }
  0x30   : > { %p1587_p2 = pnand %p1585_p1, %p1858_p13 }
  0x32   : > { %p1588_p6 = pneg %p1587_p2 }
  0x34   : > { %p1593_p3 = pnand %p1591_p10, %p1588_p6 }
  0x36   : > { %1596 = shalt.err (!%p1593_p3)
}
  0x37   : > { %s1597_s7 = scalar_lea.vmem %s1848_s10, 1024  ;;  %p1605_p12 = scmp.lt.s32.totalorder %s1848_s10, %s1848_s10 }
  0x38   : > { %p1598_p5 = scmp.ne.s32.totalorder %s1848_s10, %s1597_s7  ;;  %p1606_p0 = scmp.lt.s32.totalorder %s1597_s7, %s1597_s7 }
  0x3a   : > { %p1600_p7 = pnand %p1598_p5, %p1858_p13  ;;  %p1607_p1 = por %p1606_p0, %p1605_p12 }
  0x3c   : > { %p1601_p9 = pneg %p1600_p7 }
  0x3e   : > { %p1608_p2 = pnand %p1607_p1, %p1601_p9 }
  0x40   : > { %1611 = shalt.err (!%p1608_p2)
}
  0x41   : > { %s1750_s19 = smov 128   ;;  %s1751_s30 = smov 8  }
  0x42   : > { %1458 = dma.hbm_to_vmem [thread:$0]  (!%p1844_p11), %s2175_s3, 1024, %s1848_s10, [#allocation6], %s1750_s19, %s1750_s19, %s1751_s30  }
  0x43   : > { %s1752_s12 = smov [#allocation8]   ;;  %s1906_s14 = sadd.s32 1, %s1744_s24  }
  0x44   : > { %s227_s13 = sshll.u32 %s1752_s12, 4  ;;  %s1612_s18 = scalar_lea.hbm %s2176_s4, 1024  ;;  %s228_s13 = int_to_ptr.vmem [resolvable:$true] %s227_s13 }
  0x45   : > { %p1613_p6 = scmp.ne.s32.totalorder %s2176_s4, %s1612_s18  ;;  %p1619_p5 = scmp.lt.u32.totalorder %s1612_s18, %s2176_s4 }
  0x47   : > { %p1615_p10 = pnand %p1613_p6, %p1858_p13 }
  0x49   : > { %p1616_p3 = pneg %p1615_p10 }
  0x4b   : > { %p1621_p7 = pnand %p1619_p5, %p1616_p3 }
  0x4d   : > { %1624 = shalt.err (!%p1621_p7)
}
  0x4e   : > { %s1625_s10 = scalar_lea.vmem %s228_s13, 1024  ;;  %p1633_p1 = scmp.lt.s32.totalorder %s228_s13, %s228_s13 }
  0x4f   : > { %p1626_p9 = scmp.ne.s32.totalorder %s228_s13, %s1625_s10  ;;  %p1634_p2 = scmp.lt.s32.totalorder %s1625_s10, %s1625_s10 }
  0x51   : > { %p1628_p12 = pnand %p1626_p9, %p1858_p13  ;;  %p1635_p4 = por %p1634_p2, %p1633_p1 }
  0x53   : > { %p1629_p0 = pneg %p1628_p12 }
  0x55   : > { %p1636_p8 = pnand %p1635_p4, %p1629_p0 }
  0x57   : > { %1639 = shalt.err (!%p1636_p8)
}
  0x58   : > { %s2193_s20 = smov 4   ;;  %s2194_s19 = smov 64  }
  0x59   : > { %1461 = dma.hbm_to_vmem [thread:$0]  (!%p1844_p11), %s2176_s4, 1024, %s228_s13, [#allocation9], %s2194_s19, %s2194_s19, %s2193_s20  }
  0x5a   : > { %s28_s16 = ssub.s32 %s1744_s24, %s1906_s14  ;;  %s31_s8 = sadd.s32 1, %s1740_s23 }
  0x5b   : > { %p29_p4 = scmp.eq.s32.totalorder %s28_s16, 0  ;;  %p38_p8 = scmp.ne.s32.totalorder %s1740_s23, %s1736_s22 }
  0x5c   : > { %p39_p13 = scmp.eq.s32.totalorder %s1744_s24, 0  ;;  %p1473_p6 = scmp.lt.s32.totalorder %s1744_s24, 2 }
  0x5d   : > { %s1937_s30 = scalar_select %p29_p4, %s1740_s23, %s31_s8  }
  0x5e   : > { %p40_p10 = por %p39_p13, %p38_p8  ;;  %p2195_p3 = scmp.eq.s32.totalorder %s1814_s25, 1 }
  0x5f   : > { %s244_s11 = sand.u32 1, %s1740_s23   ;;  %s1258_s12 = sshll.u32 %s1744_s24, 9 }
  0x60   : > { %p1941_p5 = por %p2195_p3, %p38_p8  ;;  %s1205_s15 = sshll.u32 %s244_s11, 5 }
  0x61   : > { %s1950_s13 = scalar_lea.hbm %s2172_s0, %s1258_s12  ;;  %s248_s7 = scalar_lea.vmem [#allocation2], %s1205_s15 }
  0x62   : > { %s255_s10 = sshll.u32 %s248_s7, 4  ;;  %p1952_p11 = pnand %p1473_p6, %p40_p10  ;;  %s1956_s10 = int_to_ptr.vmem [resolvable:$true] %s255_s10 }
  0x63   : > { %s1958_s26 = scalar_lea.sflag [#allocation3], %s244_s11  ;;  %s1640_s16 = scalar_lea.hbm %s1950_s13, 512 }
  0x64   : > { %p1641_p7 = scmp.ne.s32.totalorder %s1950_s13, %s1640_s16  ;;  %p1642_p9 = pneg %p1952_p11 }
  0x65   : > { %s1645_s15 = scalar_lea.hbm %s2172_s0, 1024  ;;  %p1646_p1 = scmp.lt.u32.totalorder %s1950_s13, %s2172_s0 }
  0x66   : > { %p1643_p12 = pnand %p1642_p9, %p1641_p7  ;;  %p1647_p2 = scmp.lt.u32.totalorder %s1645_s15, %s1640_s16 }
  0x67   : > { %p1649_p8 = scmp.lt.u32.totalorder %s1640_s16, %s1950_s13 }
  0x68   : > { %p1644_p0 = pneg %p1643_p12  ;;  %p1648_p4 = por %p1647_p2, %p1646_p1 }
  0x6a   : > { %p1650_p13 = por %p1649_p8, %p1648_p4 }
  0x6c   : > { %p1651_p6 = pnand %p1650_p13, %p1644_p0 }
  0x6e   : > { %1654 = shalt.err (!%p1651_p6)
}
  0x6f   : > { %s1655_s11 = scalar_lea.vmem %s1956_s10, 512  ;;  %s1753_s7 = smov [#allocation2]  }
  0x70   : > { %p1656_p10 = scmp.ne.s32.totalorder %s1956_s10, %s1655_s11  ;;  %s1660_s8 = sshll.u32 %s1753_s7, 4  ;;  %s1661_s8 = int_to_ptr.vmem [resolvable:$false] %s1660_s8 }
  0x71   : > { %s1662_s12 = scalar_lea.vmem %s1661_s8, 1024  ;;  %p1663_p12 = scmp.lt.s32.totalorder %s1956_s10, %s1661_s8 }
  0x72   : > { %p1658_p3 = pnand %p1656_p10, %p1642_p9  ;;  %p1664_p1 = scmp.lt.s32.totalorder %s1662_s12, %s1655_s11 }
  0x74   : > { %p1659_p7 = pneg %p1658_p3  ;;  %p1665_p2 = por %p1664_p1, %p1663_p12 }
  0x76   : > { %p1666_p4 = pnand %p1665_p2, %p1659_p7 }
  0x78   : > { %1669 = shalt.err (!%p1666_p4)
}
  0x79   : > { %1465 = dma.hbm_to_vmem [thread:$0]  (!%p1952_p11), %s1950_s13, 512, %s1956_s10, %s1958_s26, %s2194_s19, %s2194_s19, %s2193_s20  }
  0x7a   : > { %p2198_p9 = scmp.ne.s32.totalorder %s2189_s29, 0 }
  0x7b   : > { %s1992_s16 = sand.u32 (!%p2198_p9), 1, %s1736_s22   ;;  %p2199_p0 = scmp.ne.s32.totalorder (!%p2198_p9), %s2187_s27, 0 }
  0x7c   : > { %267 = sbr.rel (%p2198_p9) target bundleno = 915 (0x393), region = 44  ;;  %s1209_s15 = sshll.u32 (!%p2198_p9), %s1992_s16, 5 }
  0x7d   : > { %s270_s17 = scalar_lea.sflag (!%p2198_p9), [#allocation3], %s1992_s16  ;;  %s1996_s18 = scalar_lea.vmem (!%p2198_p9), [#allocation2], %s1209_s15 }
  0x83   : > { %1715 = dma.done.wait (%p2199_p0), %s270_s17, 512  }
  0x84   : > { %1717 = vsyncadd (%p2199_p0), %s270_s17, 4294966784  ;;  %p2200_p11 = scmp.eq.s32.totalorder %s1814_s25, 0 }
  0x86   : > { %1719 = dma.done.wait (%p2200_p11), [#allocation6], 4096   ;;  %p2201_p8 = pmov %p2200_p11 }
  0x88   : > { %1721 = vsyncadd (%p2201_p8), [#allocation6], 4294963200  ;;  %p2202_p13 = pmov %p2201_p8 }
  0x89   : > { %p2203_p6 = pmov %p2201_p8 }
  0x8a   : > { %1723 = dma.done.wait (%p2202_p13), [#allocation9], 1024  }
  0x8b   : > { %1725 = vsyncadd (%p2203_p6), [#allocation9], 4294966272  ;;  %v1520_v0 = vld [vmem:[#allocation5 + $0x40] sm:$0xff]   ;;  %v1522_v2 = vld [vmem:[#allocation5 + $0x48] sm:$0xff]   ;;  %v1754_v28 = vmov 0.0|0.0   ;;  %vm1755_vm0 = vmmov 0   ;;  %v502_v37 = vlaneseq }
  0x8c   : > { %v1521_v1 = vld [vmem:[#allocation5] sm:$0xff]   ;;  %1313 = vmatprep.subr.bf16.mxu0 %v1520_v0  ;;  %v1523_v3 = vld [vmem:[#allocation5 + $0x8] sm:$0xff]   ;;  %v1524_v4 = vld [vmem:[#allocation5 + $0x50] sm:$0xff]   ;;  %v1756_v29 = vmov 0.0   ;;  %vm899_vm5 = vcmask 523264   ;;  %s1213_s20 = sshll.u32 %s1992_s16, 3 }
  0x8d   : > { %1314 = vmatpush3.bf16.msra.mxu0 %v1520_v0  ;;  %1337 = vmatprep.subr.bf16.mxu1 %v1521_v1  ;;  %v1525_v5 = vld [vmem:[#allocation5 + $0x10] sm:$0xff]   ;;  %v1526_v6 = vld [vmem:[#allocation5 + $0x58] sm:$0xff]   ;;  %v1528_v8 = vld [vmem:[#allocation5 + $0x60] sm:$0xff]   ;;  %v2026_v38 = vshrl.u32 %v502_v37, 7  ;;  %s1255_s10 = sshll.u32 %s1814_s25, 7  ;;  %s313_s1 = scalar_lea.vmem [#allocation10], %s1213_s20 }
  0x8e   : > { %1315 = vmatprep.subr.bf16.mxu0 %v1522_v2  ;;  %1338 = vmatpush3.bf16.msra.mxu1 %v1521_v1  ;;  %v1527_v7 = vld [vmem:[#allocation5 + $0x18] sm:$0xff]   ;;  %v1529_v9 = vld [vmem:[#allocation5 + $0x20] sm:$0xff]   ;;  %v1530_v11 = vld [vmem:[#allocation5 + $0x68] sm:$0xff]   ;;  %s1100_s26 = sshll.u32 %s313_s1, 4  ;;  %s2128_s8 = scalar_lea.hbm %s2178_s6, %s1255_s10  ;;  %s2130_s26 = int_to_ptr.vmem [resolvable:$true] %s1100_s26 }
  0x8f   : > { %1339 = vmatprep.subr.bf16.mxu1 %v1523_v3  ;;  %v1535_v10 = vld [vmem:[%s1996_s18] sm:$0xff]   ;;  %v1531_v12 = vld [vmem:[#allocation5 + $0x28] sm:$0xff]   ;;  %v1532_v13 = vld [vmem:[#allocation5 + $0x70] sm:$0xff]   ;;  %vm504_vm1 = vcmp.lt.s32.totalorder %v2026_v38, 7  ;;  %vm764_vm2 = vcmp.lt.s32.totalorder %v2026_v38, 6  ;;  %vm876_vm3 = vcmp.lt.s32.totalorder %v2026_v38, 4 }
  0x90   : > { %1329 = vmatprep.mubr.bf16.mxu0 %v1535_v10  ;;  %1353 = vmatprep.mubr.bf16.mxu1 %v1535_v10  ;;  %v1533_v14 = vld [vmem:[#allocation5 + $0x30] sm:$0xff]   ;;  %v1534_v15 = vld [vmem:[#allocation5 + $0x78] sm:$0xff]   ;;  %v1538_v17 = vld [vmem:[#allocation5 + $0x80] sm:$0xff]   ;;  %s1087_s12 = scalar_lea.sflag [#allocation4], %s1992_s16  ;;  %s1670_s25 = scalar_lea.vmem %s2130_s26, 128 }
  0x91   : > { %1316 = vmatpush3.bf16.msra.mxu0 %v1522_v2  ;;  %v1536_v16 = vld [vmem:[#allocation5 + $0x38] sm:$0xff]   ;;  %v1537_v18 = vld [vmem:[%s1996_s18 + $0x8] sm:$0xff]   ;;  %v1540_v20 = vld [vmem:[%s1996_s18 + $0x10] sm:$0xff]   ;;  %p1671_p10 = scmp.ne.s32.totalorder %s2130_s26, %s1670_s25  ;;  %s1757_s15 = smov [#allocation10]  }
  0x92   : > { %1317 = vmatprep.subr.bf16.mxu0 %v1524_v4  ;;  %1340 = vmatpush3.bf16.msra.mxu1 %v1523_v3  ;;  %v1539_v19 = vld [vmem:[#allocation5 + $0x88] sm:$0xff]   ;;  %v1542_v21 = vld [vmem:[#allocation5 + $0x90] sm:$0xff]   ;;  %v1541_v22 = vld [vmem:[%s1996_s18 + $0x18] sm:$0xff]   ;;  %s1674_s17 = sshll.u32 %s1757_s15, 4  ;;  %s1675_s17 = int_to_ptr.vmem [resolvable:$false] %s1674_s17 }
  0x93   : > { %1341 = vmatprep.subr.bf16.mxu1 %v1525_v5  ;;  %v1543_v23 = vld [vmem:[#allocation5 + $0x98] sm:$0xff]   ;;  %v1544_v24 = vld [vmem:[#allocation5 + $0xa0] sm:$0xff]   ;;  %v1545_v25 = vld [vmem:[#allocation5 + $0xa8] sm:$0xff]   ;;  %p1672_p3 = pnand %p1671_p10, %p1941_p5  ;;  %s1676_s18 = scalar_lea.vmem %s1675_s17, 256 }
  0x94   : > { %v1546_v26 = vld [vmem:[#allocation5 + $0xb0] sm:$0xff]   ;;  %v1547_v27 = vld [vmem:[#allocation5 + $0xb8] sm:$0xff]   ;;  %v1548_v30 = vld [vmem:[#allocation8] sm:$0xff]   ;;  %p1677_p12 = scmp.lt.s32.totalorder %s2130_s26, %s1675_s17  ;;  %p1678_p1 = scmp.lt.s32.totalorder %s1676_s18, %s1670_s25 }
  0x95   : > { %1318 = vmatpush3.bf16.msra.mxu0 %v1524_v4  ;;  %v1549_v31 = vld [vmem:[#allocation8 + $0x8] sm:$0xff]   ;;  %v1550_v32 = vld [vmem:[#allocation8 + $0x10] sm:$0xff]   ;;  %v1551_v33 = vld [vmem:[#allocation8 + $0x18] sm:$0xff]   ;;  %p1673_p7 = pneg %p1672_p3 }
  0x96   : > { %1319 = vmatprep.subr.bf16.mxu0 %v1526_v6  ;;  %1342 = vmatpush3.bf16.msra.mxu1 %v1525_v5  ;;  %v1552_v34 = vld [vmem:[#allocation8 + $0x20] sm:$0xff]   ;;  %v1553_v35 = vld [vmem:[#allocation8 + $0x28] sm:$0xff]   ;;  %v1554_v36 = vld [vmem:[#allocation8 + $0x30] sm:$0xff]   ;;  %p1679_p2 = por %p1678_p1, %p1677_p12 }
  0x97   : > { %1343 = vmatprep.subr.bf16.mxu1 %v1527_v7 }
  0x98   : > { %p1680_p4 = pnand %p1679_p2, %p1673_p7 }
  0x99   : > { %1320 = vmatpush3.bf16.msra.mxu0 %v1526_v6 }
  0x9a   : > { %1321 = vmatprep.subr.bf16.mxu0 %v1528_v8  ;;  %1344 = vmatpush3.bf16.msra.mxu1 %v1527_v7 }
  0x9b   : > { %1345 = vmatprep.subr.bf16.mxu1 %v1529_v9 }
  0x9d   : > { %1322 = vmatpush3.bf16.msra.mxu0 %v1528_v8 }
  0x9e   : > { %1323 = vmatprep.subr.bf16.mxu0 %v1530_v11  ;;  %1346 = vmatpush3.bf16.msra.mxu1 %v1529_v9 }
  0x9f   : > { %1347 = vmatprep.subr.bf16.mxu1 %v1531_v12 }
  0xa1   : > { %1324 = vmatpush3.bf16.msra.mxu0 %v1530_v11 }
  0xa2   : > { %1325 = vmatprep.subr.bf16.mxu0 %v1532_v13  ;;  %1348 = vmatpush3.bf16.msra.mxu1 %v1531_v12 }
  0xa3   : > { %1349 = vmatprep.subr.bf16.mxu1 %v1533_v14 }
  0xa5   : > { %1326 = vmatpush3.bf16.msra.mxu0 %v1532_v13 }
  0xa6   : > { %1327 = vmatprep.subr.bf16.mxu0 %v1534_v15  ;;  %1350 = vmatpush3.bf16.msra.mxu1 %v1533_v14 }
  0xa7   : > { %1351 = vmatprep.subr.bf16.mxu1 %v1536_v16 }
  0xa9   : > { %1328 = vmatpush3.bf16.msra.mxu0 %v1534_v15 }
  0xaa   : > { %1352 = vmatpush3.bf16.msra.mxu1 %v1536_v16  ;;  %1361 = vmatprep.subr.bf16.mxu0 %v1538_v17 }
  0xab   : > { %1404 = vmatprep.subr.bf16.mxu1 %v1756_v29 }
  0xac   : > { %1330 = vmatmul.mubr.bf16.vlgmr.msra.gmra.mrb[0].mxu0 %v1537_v18 }
  0xad   : > { %1362 = vmatpush3.bf16.msra.mxu0 %v1538_v17  ;;  %1354 = vmatmul.mubr.bf16.vlgmr.msra.gmra.mrb[0].mxu1 %v1537_v18 }
  0xae   : > { %1363 = vmatprep.subr.bf16.mxu0 %v1539_v19  ;;  %1333 = vmatprep.mubr.bf16.mxu0 %v1540_v20 }
  0xaf   : > { %1357 = vmatprep.mubr.bf16.mxu1 %v1540_v20  ;;  %1405 = vmatpush3.bf16.msra.mxu1 %v1548_v30 }
  0xb0   : > { %1406 = vmatprep.subr.bf16.mxu1 %v1756_v29 }
  0xb1   : > { %1364 = vmatpush3.bf16.msra.mxu0 %v1539_v19 }
  0xb2   : > { %1365 = vmatprep.subr.bf16.mxu0 %v1542_v21 }
  0xb3   : > { %1407 = vmatpush3.bf16.msra.mxu1 %v1549_v31 }
  0xb4   : > { %1334 = vmatmul.mubr.bf16.gmra.mrb[4].mxu0 %v1541_v22  ;;  %1408 = vmatprep.subr.bf16.mxu1 %v1756_v29 }
  0xb5   : > { %1366 = vmatpush3.bf16.msra.mxu0 %v1542_v21  ;;  %1358 = vmatmul.mubr.bf16.gmra.mrb[4].mxu1 %v1541_v22 }
  0xb6   : > { %1367 = vmatprep.subr.bf16.mxu0 %v1543_v23  ;;  %1377 = vmatprep.mubr.bf16.mxu0 %v1535_v10 }
  0xb7   : > { %1420 = vmatprep.mubr.msk.bf16.mxu1 %vm1755_vm0, %v1756_v29  ;;  %1409 = vmatpush3.bf16.msra.mxu1 %v1550_v32 }
  0xb8   : > { %1410 = vmatprep.subr.bf16.mxu1 %v1756_v29 }
  0xb9   : > { %1368 = vmatpush3.bf16.msra.mxu0 %v1543_v23 }
  0xba   : > { %1369 = vmatprep.subr.bf16.mxu0 %v1544_v24 }
  0xbb   : > { %1411 = vmatpush3.bf16.msra.mxu1 %v1551_v33 }
  0xbc   : > { %1412 = vmatprep.subr.bf16.mxu1 %v1756_v29 }
  0xbd   : > { %1370 = vmatpush3.bf16.msra.mxu0 %v1544_v24  ;;  %v1242_v24 = vld [vmem:[%s2174_s2] ss:$0 sm:$0xff] }
  0xbe   : > { %1371 = vmatprep.subr.bf16.mxu0 %v1545_v25 }
  0xbf   : > { %1413 = vmatpush3.bf16.msra.mxu1 %v1552_v34  ;;  %v806_v34 = vld [vmem:[#allocation7 + $0x10] sm:$0xff] }
  0xc0   : > { %1414 = vmatprep.subr.bf16.mxu1 %v1756_v29 }
  0xc1   : > { %1372 = vmatpush3.bf16.msra.mxu0 %v1545_v25 }
  0xc2   : > { %1373 = vmatprep.subr.bf16.mxu0 %v1546_v26 }
  0xc3   : > { %1415 = vmatpush3.bf16.msra.mxu1 %v1553_v35 }
  0xc4   : > { %1416 = vmatprep.subr.bf16.mxu1 %v1756_v29 }
  0xc5   : > { %1374 = vmatpush3.bf16.msra.mxu0 %v1546_v26 }
  0xc6   : > { %1375 = vmatprep.subr.bf16.mxu0 %v1547_v27 }
  0xc7   : > { %1417 = vmatpush3.bf16.msra.mxu1 %v1554_v36 }
  0xc8   : > { %1418 = vmatprep.subr.bf16.mxu1 %v1756_v29 }
  0xc9   : > { %1376 = vmatpush3.bf16.msra.mxu0 %v1547_v27 }
  0xca   : > { %1424 = vmatprep.subr.bf16.mxu0 %v1754_v28 }
  0xcc   : > { %1378 = vmatmul.mubr.bf16.vlgmr.msra.gmra.mrb[8].mxu0 %v1537_v18 }
  0xcd   : > { %1381 = vmatprep.mubr.bf16.mxu0 %v1540_v20 }
  0xd4   : > { %1382 = vmatmul.mubr.bf16.gmra.mrb[12].mxu0 %v1541_v22 }
  0xd5   : > { %1401 = vmatprep.mubr.msk.f32.mxu0 %vm1755_vm0, %v1756_v29 }
 0x17f   : > { %v1331_v39 = vpop.f32.mrb[0].mxu0 }
 0x180   : > { %v496_v40 = vrot.slane %v1331_v39, 1  ;;  %v463_v41 = vpop.f32.mrb[1].mxu0  ;;  %v1355_v42 = vpop.f32.mrb[0].mxu1 }
 0x181   : > { %v1332_v43 = vpop.f32.mrb[2].mxu0  ;;  %v595_v44 = vpop.f32.mrb[1].mxu1  ;;  %v494_v48 = vrot.slane %v463_v41, 1  ;;  %v804_v41 = vld [vmem:[#allocation7] sm:$0xff] }
 0x182   : > { %v497_v45 = vrot.slane %v1332_v43, 1  ;;  %v466_v46 = vpop.f32.mrb[3].mxu0  ;;  %v1356_v47 = vpop.f32.mrb[2].mxu1 }
 0x183   : > { %v495_v49 = vrot.slane %v466_v46, 1  ;;  %v598_v50 = vpop.f32.mrb[3].mxu1 }
 0x184   : > { %v509_v51 = vsel %vm504_vm1, %v496_v40, %v497_v45 }
 0x185   : > { %v604_v52 = vadd.f32 %v1355_v42, %v509_v51  ;;  %v511_v53 = vsel %vm504_vm1, %v494_v48, %v495_v49  ;;  %v510_v54 = vsel %vm504_vm1, %v495_v49, %v496_v40  ;;  %v805_v42 = vld [vmem:[#allocation7 + $0x8] sm:$0xff] }
 0x186   : > { %v596_v55 = vadd.f32 %v595_v44, %v511_v53  ;;  %v599_v56 = vadd.f32 %v598_v50, %v510_v54 }
 0x187   : > { %v1335_v57 = vpop.f32.mrb[4].mxu0 }
 0x188   : > { %v500_v58 = vrot.slane %v1335_v57, 1  ;;  %v479_v59 = vpop.f32.mrb[5].mxu0  ;;  %v1359_v60 = vpop.f32.mrb[4].mxu1 }
 0x189   : > { %v498_v61 = vrot.slane %v479_v59, 1  ;;  %v1336_v62 = vpop.f32.mrb[6].mxu0  ;;  %v611_v63 = vpop.f32.mrb[5].mxu1 }
 0x18a   : > { %v501_v0 = vrot.slane %v1336_v62, 1  ;;  %v1360_v1 = vpop.f32.mrb[6].mxu1  ;;  %v482_v2 = vpop.f32.mrb[7].mxu0 }
 0x18b   : > { %v508_v3 = vsel %vm504_vm1, %v497_v45, %v498_v61  ;;  %v499_v4 = vrot.slane %v482_v2, 1  ;;  %v614_v5 = vpop.f32.mrb[7].mxu1 }
 0x18c   : > { %v607_v6 = vadd.f32 %v1356_v47, %v508_v3  ;;  %v505_v7 = vsel %vm504_vm1, %v500_v58, %v501_v0  ;;  %v512_v8 = vsel %vm504_vm1, %v501_v0, %v494_v48 }
 0x18d   : > { %v620_v9 = vadd.f32 %v1359_v60, %v505_v7  ;;  %v623_v10 = vadd.f32 %v1360_v1, %v512_v8  ;;  %v507_v11 = vsel %vm504_vm1, %v498_v61, %v499_v4  ;;  %v506_v12 = vsel %vm504_vm1, %v499_v4, %v500_v58  ;;  %v807_v1 = vld [vmem:[#allocation7 + $0x18] sm:$0xff] }
 0x18e   : > { %v612_v13 = vadd.f32 %v611_v63, %v507_v11  ;;  %v615_v14 = vadd.f32 %v614_v5, %v506_v12 }
 0x19f   : > { %v1379_v15 = vpop.f32.mrb[8].mxu0 }
 0x1a0   : > { %v725_v16 = vpop.f32.mrb[9].mxu0  ;;  %v758_v18 = vrot.slane %v1379_v15, 2 }
 0x1a1   : > { %v1380_v17 = vpop.f32.mrb[10].mxu0  ;;  %v756_v21 = vrot.slane %v725_v16, 2  ;;  %v811_v16 = vld [vmem:[#allocation7 + $0x38] sm:$0xff] }
 0x1a2   : > { %v759_v19 = vrot.slane %v1380_v17, 2  ;;  %v728_v20 = vpop.f32.mrb[11].mxu0 }
 0x1a3   : > { %v757_v22 = vrot.slane %v728_v20, 2 }
 0x1a4   : > { %v769_v23 = vsel %vm764_vm2, %v758_v18, %v759_v19 }
 0x1a5   : > { %v775_v25 = vadd.f32 %v769_v23, %v604_v52  ;;  %v770_v26 = vsel %vm764_vm2, %v757_v22, %v758_v18  ;;  %v771_v27 = vsel %vm764_vm2, %v756_v21, %v757_v22  ;;  %v809_v23 = vld [vmem:[#allocation7 + $0x28] sm:$0xff] }
 0x1a6   : > { %v773_v30 = vadd.f32 %v771_v27, %v596_v55  ;;  %v774_v31 = vadd.f32 %v770_v26, %v599_v56 }
 0x1a7   : > { %v790_v32 = vadd.f32 %v1242_v24, %v775_v25  ;;  %v1383_v33 = vpop.f32.mrb[12].mxu0 }
 0x1a8   : > { %v788_v35 = vadd.f32 %v1242_v24, %v773_v30  ;;  %v789_v36 = vadd.f32 %v1242_v24, %v774_v31  ;;  %v741_v39 = vpop.f32.mrb[13].mxu0  ;;  %v762_v47 = vrot.slane %v1383_v33, 2  ;;  %v808_v30 = vld [vmem:[#allocation7 + $0x20] sm:$0xff] }
 0x1a9   : > { %v798_v40 = vmax.f32 %v790_v32, 0.0  ;;  %v760_v43 = vrot.slane %v741_v39, 2  ;;  %v1384_v44 = vpop.f32.mrb[14].mxu0 }
 0x1aa   : > { %v796_v45 = vmax.f32 %v788_v35, 0.0  ;;  %v797_v46 = vmax.f32 %v789_v36, 0.0  ;;  %v763_v48 = vrot.slane %v1384_v44, 2  ;;  %v744_v49 = vpop.f32.mrb[15].mxu0 }
 0x1ab   : > { %v814_v50 = vmul.f32 %v806_v34, %v798_v40  ;;  %v768_v51 = vsel %vm764_vm2, %v759_v19, %v760_v43  ;;  %v761_v52 = vrot.slane %v744_v49, 2 }
 0x1ac   : > { %v812_v53 = vmul.f32 %v804_v41, %v796_v45  ;;  %v813_v54 = vmul.f32 %v805_v42, %v797_v46  ;;  %v776_v55 = vadd.f32 %v768_v51, %v607_v6  ;;  %v765_v56 = vsel %vm764_vm2, %v762_v47, %v763_v48 }
 0x1ad   : > { %v822_v57 = vrot.slane %v814_v50, 1  ;;  %v772_v58 = vsel %vm764_vm2, %v763_v48, %v756_v21  ;;  %v779_v59 = vadd.f32 %v765_v56, %v620_v9  ;;  %v766_v60 = vsel %vm764_vm2, %v761_v52, %v762_v47  ;;  %v810_v9 = vld [vmem:[#allocation7 + $0x30] sm:$0xff] }
 0x1ae   : > { %v820_v61 = vrot.slane %v812_v53, 1  ;;  %v821_v62 = vrot.slane %v813_v54, 1  ;;  %v791_v63 = vadd.f32 %v1242_v24, %v776_v55  ;;  %v780_v0 = vadd.f32 %v772_v58, %v623_v10 }
 0x1af   : > { %v794_v2 = vadd.f32 %v1242_v24, %v779_v59  ;;  %v767_v3 = vsel %vm764_vm2, %v760_v43, %v761_v52  ;;  %v778_v4 = vadd.f32 %v766_v60, %v615_v14 }
 0x1b0   : > { %v833_v5 = vsel %vm504_vm1, %v821_v62, %v822_v57  ;;  %v834_v6 = vsel %vm504_vm1, %v820_v61, %v821_v62  ;;  %v799_v7 = vmax.f32 %v791_v63, 0.0  ;;  %v795_v8 = vadd.f32 %v1242_v24, %v780_v0 }
 0x1b1   : > { %v836_v11 = vmax.f32 %v812_v53, %v834_v6  ;;  %v837_v12 = vmax.f32 %v813_v54, %v833_v5  ;;  %v802_v15 = vmax.f32 %v794_v2, 0.0  ;;  %v777_v10 = vadd.f32 %v767_v3, %v612_v13 }
 0x1b2   : > { %v815_v17 = vmul.f32 %v807_v1, %v799_v7  ;;  %v803_v18 = vmax.f32 %v795_v8, 0.0  ;;  %v793_v19 = vadd.f32 %v1242_v24, %v778_v4 }
 0x1b3   : > { %v844_v20 = vrot.slane %v836_v11, 2  ;;  %v845_v21 = vrot.slane %v837_v12, 2  ;;  %v818_v14 = vmul.f32 %v810_v9, %v802_v15  ;;  %v792_v22 = vadd.f32 %v1242_v24, %v777_v10 }
 0x1b4   : > { %v823_v25 = vrot.slane %v815_v17, 1  ;;  %v819_v26 = vmul.f32 %v811_v16, %v803_v18  ;;  %v801_v27 = vmax.f32 %v793_v19, 0.0 }
 0x1b5   : > { %v826_v31 = vrot.slane %v818_v14, 1  ;;  %v800_v32 = vmax.f32 %v792_v22, 0.0  ;;  %v858_v33 = vsel %vm764_vm2, %v844_v20, %v845_v21 }
 0x1b6   : > { %v832_v13 = vsel %vm504_vm1, %v822_v57, %v823_v25  ;;  %v827_v34 = vrot.slane %v819_v26, 1  ;;  %v817_v35 = vmul.f32 %v809_v23, %v801_v27  ;;  %v860_v36 = vmax.f32 %v836_v11, %v858_v33 }
 0x1b7   : > { %v838_v39 = vmax.f32 %v814_v50, %v832_v13  ;;  %v816_v40 = vmul.f32 %v808_v30, %v800_v32 }
 0x1b8   : > { %v828_v24 = vsel %vm504_vm1, %v826_v31, %v827_v34  ;;  %v835_v41 = vsel %vm504_vm1, %v827_v34, %v820_v61  ;;  %v825_v42 = vrot.slane %v817_v35, 1  ;;  %v868_v63 = vrot.slane %v860_v36, 4 }
 0x1b9   : > { %v842_v43 = vmax.f32 %v818_v14, %v828_v24  ;;  %v843_v44 = vmax.f32 %v819_v26, %v835_v41  ;;  %v824_v45 = vrot.slane %v816_v40, 1  ;;  %v846_v46 = vrot.slane %v838_v39, 2 }
 0x1ba   : > { %v829_v47 = vsel %vm504_vm1, %v825_v42, %v826_v31  ;;  %v894_v24 = vand.u32 127, %v502_v37  ;;  %v895_v41 = vmul.u32 8, %v2026_v38  ;;  %v1245_v37 = vld [vmem:[%s2177_s5] ss:$0 sm:$0xff] }
 0x1bb   : > { %v850_v48 = vrot.slane %v842_v43, 2  ;;  %v851_v49 = vrot.slane %v843_v44, 2  ;;  %v830_v50 = vsel %vm504_vm1, %v824_v45, %v825_v42  ;;  %v831_v51 = vsel %vm504_vm1, %v823_v25, %v824_v45 }
 0x1bc   : > { %v839_v52 = vmax.f32 %v815_v17, %v831_v51  ;;  %v840_v53 = vmax.f32 %v816_v40, %v830_v50  ;;  %v841_v54 = vmax.f32 %v817_v35, %v829_v47  ;;  %v857_v55 = vsel %vm764_vm2, %v845_v21, %v846_v46 }
 0x1bd   : > { %v852_v56 = vsel %vm764_vm2, %v850_v48, %v851_v49  ;;  %v861_v57 = vmax.f32 %v837_v12, %v857_v55  ;;  %v859_v58 = vsel %vm764_vm2, %v851_v49, %v844_v20  ;;  %vm896_vm4 = vcmp.eq.s32.totalorder %v894_v24, %v895_v41 }
 0x1be   : > { %v866_v59 = vmax.f32 %v842_v43, %v852_v56  ;;  %v847_v60 = vrot.slane %v839_v52, 2  ;;  %v848_v61 = vrot.slane %v840_v53, 2  ;;  %v849_v62 = vrot.slane %v841_v54, 2  ;;  %v1555_v43 = vld [vmem:[#allocation8 + $0x38] sm:$0xff]  }
 0x1bf   : > { %v869_v0 = vrot.slane %v861_v57, 4  ;;  %v867_v1 = vmax.f32 %v843_v44, %v859_v58  ;;  %v1243_v42 = vsel %vm896_vm4, 1.0, %v1756_v29  ;;  %1419 = vmatpush3.bf16.msra.mxu1 %v1555_v43 }
 0x1c0   : > { %v854_v2 = vsel %vm764_vm2, %v848_v61, %v849_v62  ;;  %v856_v3 = vsel %vm764_vm2, %v846_v46, %v847_v60  ;;  %v855_v4 = vsel %vm764_vm2, %v847_v60, %v848_v61  ;;  %v853_v5 = vsel %vm764_vm2, %v849_v62, %v850_v48 }
 0x1c1   : > { %v864_v6 = vmax.f32 %v840_v53, %v854_v2  ;;  %v862_v7 = vmax.f32 %v838_v39, %v856_v3  ;;  %v883_v8 = vsel %vm876_vm3, %v868_v63, %v869_v0  ;;  %v863_v9 = vmax.f32 %v839_v52, %v855_v4 }
 0x1c2   : > { %v885_v11 = vmax.f32 %v860_v36, %v883_v8  ;;  %v865_v12 = vmax.f32 %v841_v54, %v853_v5  ;;  %v874_v15 = vrot.slane %v866_v59, 4  ;;  %v875_v16 = vrot.slane %v867_v1, 4 }
 0x1c3   : > { %v870_v10 = vrot.slane %v862_v7, 4  ;;  %v871_v17 = vrot.slane %v863_v9, 4  ;;  %v872_v18 = vrot.slane %v864_v6, 4 }
 0x1c4   : > { %v873_v19 = vrot.slane %v865_v12, 4  ;;  %v877_v20 = vsel %vm876_vm3, %v874_v15, %v875_v16  ;;  %v884_v21 = vsel %vm876_vm3, %v875_v16, %v868_v63 }
 0x1c5   : > { %v882_v14 = vsel %vm876_vm3, %v869_v0, %v870_v10  ;;  %v880_v22 = vsel %vm876_vm3, %v871_v17, %v872_v18  ;;  %v881_v23 = vsel %vm876_vm3, %v870_v10, %v871_v17  ;;  %v891_v25 = vmax.f32 %v866_v59, %v877_v20 }
 0x1c6   : > { %v886_v26 = vmax.f32 %v861_v57, %v882_v14  ;;  %v887_v27 = vmax.f32 %v862_v7, %v881_v23  ;;  %v888_v30 = vmax.f32 %v863_v9, %v880_v22  ;;  %v878_v31 = vsel %vm876_vm3, %v873_v19, %v874_v15 }
 0x1c7   : > { %v879_v32 = vsel %vm876_vm3, %v872_v18, %v873_v19  ;;  %v890_v33 = vmax.f32 %v865_v12, %v878_v31  ;;  %v892_v13 = vmax.f32 %v867_v1, %v884_v21 }
 0x1c8   : > { %v1425_v34 = vpack.c.bf16 %v886_v26, %v885_v11  ;;  %v1428_v35 = vpack.c.bf16 %v888_v30, %v887_v27  ;;  %v889_v36 = vmax.f32 %v864_v6, %v879_v32 }
 0x1c9   : > { %v1434_v39 = vpack.c.bf16 %v892_v13, %v891_v25 }
 0x1ca   : > { %1426 = vmatpush3.bf16.msra.mxu0 %v1425_v34  ;;  %v1431_v40 = vpack.c.bf16 %v890_v33, %v889_v36 }
 0x1cb   : > { %1427 = vmatprep.subr.bf16.mxu0 %v1754_v28 }
 0x1ce   : > { %1429 = vmatpush3.bf16.msra.mxu0 %v1428_v35 }
 0x1cf   : > { %1430 = vmatprep.subr.bf16.mxu0 %v1754_v28 }
 0x1d2   : > { %1432 = vmatpush3.bf16.msra.mxu0 %v1431_v40 }
 0x1d3   : > { %1433 = vmatprep.subr.bf16.mxu0 %v1754_v28 }
 0x1d6   : > { %1435 = vmatpush3.bf16.msra.mxu0 %v1434_v39 }
 0x1d9   : > { %1402 = vmatmul.mubr.msk.f32.vlgmr.msra.gmra.mrb[16].mxu0 %vm899_vm5, %v1243_v42 }
 0x2ac   : > { %v969_v44 = vpop.f32.mrb[16].mxu0 }
 0x2ad   : > { %v973_v45 = vpack.c.bf16 %v969_v44, %v969_v44  ;;  %v1403_v46 = vpop.f32.mrb[17].mxu0 }
 0x2af   : > { %1421 = vmatmul.mubr.bf16.vlgmr.msra.gmra.mrb[8].mxu1 %v973_v45 }
 0x382   : > { %v1079_v28 = vpop.f32.mrb[8].mxu1 }
 0x383   : > { %v1080_v29 = vadd.f32 %v1245_v37, %v1079_v28  ;;  %v1422_v38 = vpop.f32.mrb[9].mxu1 }
 0x384   : > { %v1082_v47 = vpop.f32.mrb[10].mxu1 }
 0x385   : > { %1085 = vst [vmem:[%s313_s1] sm:$0xff] %v1080_v29  ;;  %v1423_v48 = vpop.f32.mrb[11].mxu1 }
 0x386   : > { %1683 = shalt.err (!%p1680_p4)
}
 0x387   : > { %s1684_s16 = scalar_lea.hbm %s2128_s8, 128  ;;  %s1688_s20 = scalar_lea.hbm %s2178_s6, 256 }
 0x388   : > { %p1685_p9 = scmp.ne.s32.totalorder %s2128_s8, %s1684_s16  ;;  %p1689_p8 = scmp.lt.u32.totalorder %s2128_s8, %s2178_s6 }
 0x389   : > { %p1690_p13 = scmp.lt.u32.totalorder %s1688_s20, %s1684_s16  ;;  %p1692_p10 = scmp.lt.u32.totalorder %s1684_s16, %s2128_s8 }
 0x38a   : > { %p1686_p0 = pnand %p1685_p9, %p1941_p5 }
 0x38b   : > { %p1691_p6 = por %p1690_p13, %p1689_p8 }
 0x38c   : > { %p1687_p11 = pneg %p1686_p0 }
 0x38d   : > { %p1693_p3 = por %p1692_p10, %p1691_p6 }
 0x38f   : > { %p1694_p7 = pnand %p1693_p3, %p1687_p11 }
 0x391   : > { %1697 = shalt.err (!%p1694_p7)
}
 0x392   : > { %1450 = dma.vmem_to_hbm [thread:$0]  (%p1941_p5), %s2130_s26, 128, %s2128_s8, %s1087_s12  }
 0x393 PF: > { %s1112_s10 = sand.u32 1, %s1732_s21   ;;  %p2204_p12 = scmp.ne.s32.totalorder %s2188_s28, 0 }
 0x394   : > { %p2205_p1 = scmp.ge.s32.totalorder %s1744_s24, 2  ;;  %s1113_s1 = scalar_lea.sflag [#allocation4], %s1112_s10 }
 0x396   : > { %p1467_p2 = pnand %p2205_p1, %p2204_p12 }
 0x398   : > { %1727 = dma.done.wait (!%p1467_p2), %s1113_s1, 128  }
 0x399   : > { %1729 = vsyncadd (!%p1467_p2), %s1113_s1, 4294967168  ;;  %p21_p4 = scmp.ge.s32.totalorder %s1906_s14, 4   ;;  %s2206_s21 = smov %s1736_s22 }
 0x39a   : > { %s2207_s22 = smov %s1740_s23  ;;  %s2208_s23 = smov %s1937_s30 }
 0x39b   : > { %s2209_s24 = smov %s1906_s14  ;;  %23 = sbr.rel (!%p21_p4) target bundleno = 9 (0x9), region = 103 }
 0x3a2   :  { %1118 = vsyncpa [#allocation3], 1 }
 0x3a3   :  { %1120 = vsyncpa [#allocation3 + $0x1], 1 }
 0x3a4   :  { %1121 = vsyncpa [#allocation6], 1 }
 0x3a5   :  { %1122 = vsyncpa [#allocation9], 1 }
 0x3a6   :  { %1123 = vsyncpa [#allocation4], 1 }
 0x3a7   :  { %1125 = vsyncpa [#allocation4 + $0x1], 1 }

</bundles_post_ra>
